<compile_context>
chip_gen: v7x
topology: tpu7x:2x2x1
jax: 0.10.0
libtpu: 0.0.40
codegen_flags: <defaults>
</compile_context>

<pallas_src>
import functools
from typing import NamedTuple

import jax
import jax.numpy as jnp
from jax.experimental import pallas as pl
from jax.experimental.pallas import tpu as pltpu


def _round_up(x, m):
    return ((x + m - 1) // m) * m


def _tpu_generation():
    """Returns (lowercased device_kind, per-core VMEM capacity in bytes)."""
    kind = ""
    try:
        kind = jax.devices()[0].device_kind.lower()
    except Exception:
        pass
    vmem = None
    try:
        vmem = int(pltpu.get_tpu_info().vmem_capacity_bytes)
    except Exception:
        pass
    if vmem is None:
        # Conservative fallback: v7x (and unknown) -> 64 MiB, v5e/v6e-class -> 128 MiB.
        vmem = 64 * 1024 * 1024 if ("v7" in kind or not kind) else 128 * 1024 * 1024
    return kind, vmem


def _choose_tff(d_ff, target):
    """Pad d_ff only to a multiple of 128; pick the largest tff <= target that is
    a multiple of 128 and divides the padded d_ff (no dead columns)."""
    d_ff_p = _round_up(d_ff, 128)
    t = max(128, min((target // 128) * 128, d_ff_p))
    tff = 128
    for cand in range(t, 127, -128):
        if d_ff_p % cand == 0:
            tff = cand
            break
    return tff, d_ff_p


class GLUParams(NamedTuple):
    wab: jax.Array       # (d_model_p, 2*d_ff_p)  per-tff-tile [Wa | Wb] interleave, compute dtype
    bab: jax.Array       # (1, 2*d_ff_p) f32      per-tff-tile [ba | bb] interleave
    wd: jax.Array        # (d_ff_p, d_model_p)    compute dtype
    bd: jax.Array        # (1, d_model_p) f32
    d_model: int
    d_ff: int
    d_model_p: int
    d_ff_p: int
    tff: int


def prepare_glu_params(wa, ba, wb, bb, wd, bd, *, compute_dtype=jnp.bfloat16,
                       tff_target=512):
    """One-time parameter conversion (hoisted out of the per-forward path)."""
    d_model, d_ff = wa.shape
    d_model_p = _round_up(d_model, 128)
    tff, d_ff_p = _choose_tff(d_ff, tff_target)
    nj = d_ff_p // tff

    pad_in = d_model_p - d_model
    pad_ff = d_ff_p - d_ff

    wa_p = jnp.pad(wa, ((0, pad_in), (0, pad_ff))).astype(compute_dtype)
    wb_p = jnp.pad(wb, ((0, pad_in), (0, pad_ff))).astype(compute_dtype)
    # Per-tile interleave: one BlockSpec tile of width 2*tff holds the j-th
    # column tile of Wa followed by the j-th column tile of Wb.
    wab = jnp.concatenate(
        [wa_p.reshape(d_model_p, nj, tff), wb_p.reshape(d_model_p, nj, tff)],
        axis=2).reshape(d_model_p, 2 * d_ff_p)

    ba_p = jnp.pad(ba, (0, pad_ff)).astype(jnp.float32)
    bb_p = jnp.pad(bb, (0, pad_ff)).astype(jnp.float32)
    bab = jnp.concatenate(
        [ba_p.reshape(nj, tff), bb_p.reshape(nj, tff)], axis=1
    ).reshape(1, 2 * d_ff_p)

    wd_p = jnp.pad(wd, ((0, pad_ff), (0, pad_in))).astype(compute_dtype)
    bd_p = jnp.pad(bd, (0, pad_in)).reshape(1, d_model_p).astype(jnp.float32)

    return GLUParams(wab, bab, wd_p, bd_p, d_model, d_ff, d_model_p, d_ff_p, tff)


def _glu_kernel(x_ref, wab_ref, bab_ref, wd_ref, bd_ref, o_ref, acc_ref, *, tff):
    j = pl.program_id(1)

    x = x_ref[...]                                                   # (tm, dmp) bf16
    # Fused up-projection: one MXU pass for [Wa | Wb], f32 accumulation.
    ab = jnp.dot(x, wab_ref[...], preferred_element_type=jnp.float32) + bab_ref[...]
    a = ab[:, :tff]
    b = ab[:, tff:]
    # swish(b) = sigmoid(b) * b ; gated: up = a * swish(b)   (f32, (tm, tff))
    up = a * (jax.nn.sigmoid(b) * b)
    partial = jnp.dot(up.astype(wd_ref.dtype), wd_ref[...],
                      preferred_element_type=jnp.float32)            # (tm, dmp) f32

    @pl.when(j == 0)
    def _first():
        acc_ref[...] = partial          # write-on-first-step (no zero-init pass)

    @pl.when(j > 0)
    def _accumulate():
        acc_ref[...] += partial

    @pl.when(j == pl.num_programs(1) - 1)
    def _finalize():
        o_ref[...] = (acc_ref[...] + bd_ref[...]).astype(o_ref.dtype)


def _vmem_footprint(tm, tff, d_model_p, c_itemsize, out_itemsize):
    """Per-step VMEM bytes (double-buffered operands + f32 accumulator)."""
    x_b = 2 * tm * d_model_p * c_itemsize
    wab_b = 2 * d_model_p * (2 * tff) * c_itemsize
    bab_b = 2 * (2 * tff) * 4
    wd_b = 2 * tff * d_model_p * c_itemsize
    bd_b = 2 * d_model_p * 4
    out_b = 2 * tm * d_model_p * out_itemsize
    acc_b = tm * d_model_p * 4
    return x_b + wab_b + bab_b + wd_b + bd_b + out_b + acc_b


def glu_forward(x, params: GLUParams, *, out_dtype=jnp.bfloat16, tm=None):
    """x: (B, S, d_model). Returns (B, S, d_model) in out_dtype."""
    B, S, d_model = x.shape
    assert d_model == params.d_model
    d_model_p, d_ff_p, tff = params.d_model_p, params.d_ff_p, params.tff
    compute_dtype = params.wab.dtype
    c_itemsize = jnp.dtype(compute_dtype).itemsize
    out_itemsize = jnp.dtype(out_dtype).itemsize

    kind, vmem_cap = _tpu_generation()
    vmem_limit = int(vmem_cap * 0.85)        # ~15% headroom for Mosaic internal scratch

    M = B * S
    M8 = _round_up(M, 8)

    if tm is None:
        if "v5e" in kind or "v5 lite" in kind:
            tm = 256                          # v5e is already ~compute-bound at 256
        elif "v7" in kind or vmem_cap <= 80 * 1024 * 1024:
            tm = 512                          # v7x: 64 MiB VMEM per TC
        else:
            tm = 1024                         # v6e / 128 MiB-class parts
    tm = min(tm, M8)
    # v7x megacore: ensure the "parallel" M axis has >= 2 balanced tiles.
    if "v7" in kind and M8 >= 512 and M8 // tm < 2:
        tm = _round_up(-(-M8 // 2), 8)
    # Shrink tm until the per-step footprint fits comfortably in the VMEM budget.
    while tm > 256 and _vmem_footprint(tm, tff, d_model_p, c_itemsize,
                                       out_itemsize) > int(0.75 * vmem_limit):
        tm = max(256, _round_up(tm // 2, 8))

    M_p = _round_up(M, tm)

    # Zero padding is exact: padded d_ff columns give a=b=0 -> up=0 -> no
    # contribution; padded d_model output columns / M rows are sliced off.
    x2 = jnp.pad(x.reshape(M, d_model),
                 ((0, M_p - M), (0, d_model_p - d_model))).astype(compute_dtype)

    grid = (M_p // tm, d_ff_p // tff)
    n_i = grid[0]

    cost = pl.CostEstimate(
        flops=6 * M_p * d_model_p * d_ff_p + 4 * M_p * d_ff_p,
        transcendentals=M_p * d_ff_p,
        bytes_accessed=(
            M_p * d_model_p * c_itemsize                         # x (read once per row tile)
            + n_i * 3 * d_model_p * d_ff_p * c_itemsize          # Wa|Wb + Wd re-streamed per i tile
            + n_i * (2 * d_ff_p + d_model_p) * 4                 # biases
            + M_p * d_model_p * out_itemsize                     # output writeback
        ),
    )

    kernel = functools.partial(_glu_kernel, tff=tff)

    out2 = pl.pallas_call(
        kernel,
        out_shape=jax.ShapeDtypeStruct((M_p, d_model_p), out_dtype),
        grid_spec=pltpu.PrefetchScalarGridSpec(
            num_scalar_prefetch=0,
            grid=grid,
            in_specs=[
                pl.BlockSpec((tm, d_model_p), lambda i, j: (i, 0)),       # x rows (resident over j)
                pl.BlockSpec((d_model_p, 2 * tff), lambda i, j: (0, j)),  # fused [Wa|Wb] column tile
                pl.BlockSpec((1, 2 * tff), lambda i, j: (0, j)),          # fused [ba|bb] tile
                pl.BlockSpec((tff, d_model_p), lambda i, j: (j, 0)),      # Wd row tile
                pl.BlockSpec((1, d_model_p), lambda i, j: (0, 0)),        # bd
            ],
            out_specs=pl.BlockSpec((tm, d_model_p), lambda i, j: (i, 0)),
            scratch_shapes=[pltpu.VMEM((tm, d_model_p), jnp.float32)],
        ),
        compiler_params=pltpu.CompilerParams(
            # d_ff reduction must stay the innermost / "arbitrary" axis.
            dimension_semantics=("parallel", "arbitrary"),
            vmem_limit_bytes=vmem_limit,
        ),
        cost_estimate=cost,
    )(x2, params.wab, params.bab, params.wd, params.bd)

    return out2[:M, :d_model].reshape(B, S, d_model)


def glu_reference(x, wa, ba, wb, bb, wd, bd):
    a = x @ wa + ba
    b = x @ wb + bb
    up = a * (jax.nn.sigmoid(b) * b)
    return up @ wd + bd


if __name__ == "__main__":
    # Small config consistent with MiniKLConfig / GLU:
    #   d_model = 48  ->  d_ff = 2*4*48 // 3 = 128
    B, S, d_model = 2, 8, 48
    d_ff = 2 * 4 * d_model // 3  # 128

    key = jax.random.PRNGKey(0)
    kx, ka, kba, kb, kbb, kd, kbd = jax.random.split(key, 7)

    # Deterministic parameter init (nn.Linear-style uniform bounds), stored as (in, out).
    lim_up = 1.0 / (d_model ** 0.5)
    lim_dn = 1.0 / (d_ff ** 0.5)
    wa = jax.random.uniform(ka, (d_model, d_ff), jnp.float32, -lim_up, lim_up)
    ba = jax.random.uniform(kba, (d_ff,), jnp.float32, -lim_up, lim_up)
    wb = jax.random.uniform(kb, (d_model, d_ff), jnp.float32, -lim_up, lim_up)
    bb = jax.random.uniform(kbb, (d_ff,), jnp.float32, -lim_up, lim_up)
    wd = jax.random.uniform(kd, (d_ff, d_model), jnp.float32, -lim_dn, lim_dn)
    bd = jax.random.uniform(kbd, (d_model,), jnp.float32, -lim_dn, lim_dn)

    x = jax.random.normal(kx, (B, S, d_model), jnp.float32)

    # One-time parameter conversion (padded, fused, bf16) — not in the per-call path.
    params = prepare_glu_params(wa, ba, wb, bb, wd, bd)

    out = glu_forward(x, params)
    out = jax.block_until_ready(out)

    ref = glu_reference(x, wa, ba, wb, bb, wd, bd)
    assert out.shape == (B, S, d_model)
    # bf16 MXU operands + bf16 output with f32 accumulation -> relaxed tolerance.
    err = jnp.max(jnp.abs(out.astype(jnp.float32) - ref))
    assert jnp.allclose(out.astype(jnp.float32), ref, atol=5e-2, rtol=5e-2), (
        "mismatch vs reference, max abs err = " + str(float(err)))

    print("KERNEL_OK")
</pallas_src>

<mosaic_0001>
module attributes {stable_mosaic.version = 11 : i64} {
  func.func @_glu_kernel(%arg0: i32, %arg1: i32, %arg2: memref<16x128xbf16, #tpu.memory_space<vmem>>, %arg3: memref<128x256xbf16, #tpu.memory_space<vmem>>, %arg4: memref<1x256xf32, #tpu.memory_space<vmem>>, %arg5: memref<128x128xbf16, #tpu.memory_space<vmem>>, %arg6: memref<1x128xf32, #tpu.memory_space<vmem>>, %arg7: memref<16x128xbf16, #tpu.memory_space<vmem>>, %arg8: memref<16x128xf32, #tpu.memory_space<vmem>>) attributes {dimension_semantics = [#tpu.dimension_semantics<parallel>, #tpu.dimension_semantics<arbitrary>], iteration_bounds = array<i64: 1, 1>, scalar_prefetch = 0 : i64, scratch_operands = 1 : i64, tpu.core_type = #tpu.core_type<tc>, window_params = [{transform_indices = @transform_0, window_bounds = array<i64: 16, 128>}, {transform_indices = @transform_1, window_bounds = array<i64: 128, 256>}, {transform_indices = @transform_2, window_bounds = array<i64: 1, 256>}, {transform_indices = @transform_3, window_bounds = array<i64: 128, 128>}, {pipeline_mode = #tpu.pipeline_mode<synchronous>, transform_indices = @transform_4, window_bounds = array<i64: 1, 128>}, {transform_indices = @transform_5, window_bounds = array<i64: 16, 128>}]} {
    %c0 = arith.constant 0 : index
    %c0_0 = arith.constant 0 : index
    %0 = vector.load %arg2[%c0, %c0_0] : memref<16x128xbf16, #tpu.memory_space<vmem>>, vector<16x128xbf16>
    %c0_1 = arith.constant 0 : index
    %c0_2 = arith.constant 0 : index
    %1 = vector.load %arg3[%c0_1, %c0_2] : memref<128x256xbf16, #tpu.memory_space<vmem>>, vector<128x256xbf16>
    %cst = arith.constant dense<0.000000e+00> : vector<16x256xf32>
    %2 = tpu.matmul %0, %1, %cst {dimension_numbers = #tpu.dot_dimension_numbers<[1], [0], [0], [1], [0, 0, 1, 1], [], []>} : vector<16x128xbf16>, vector<128x256xbf16>, vector<16x256xf32> -> vector<16x256xf32>
    %c0_3 = arith.constant 0 : index
    %c0_4 = arith.constant 0 : index
    %3 = vector.load %arg4[%c0_3, %c0_4] : memref<1x256xf32, #tpu.memory_space<vmem>>, vector<1x256xf32>
    %4 = vector.broadcast %3 : vector<1x256xf32> to vector<16x256xf32>
    %5 = arith.addf %2, %4 : vector<16x256xf32>
    %6 = vector.extract_strided_slice %5 {offsets = [0, 0], sizes = [16, 128], strides = [1, 1]} : vector<16x256xf32> to vector<16x128xf32>
    %7 = vector.extract_strided_slice %5 {offsets = [0, 128], sizes = [16, 128], strides = [1, 1]} : vector<16x256xf32> to vector<16x128xf32>
    %8 = arith.negf %7 : vector<16x128xf32>
    %9 = math.exp %8 : vector<16x128xf32>
    %cst_5 = arith.constant 1.000000e+00 : f32
    %10 = vector.broadcast %cst_5 : f32 to vector<16x128xf32>
    %11 = arith.addf %10, %9 : vector<16x128xf32>
    %12 = arith.divf %10, %11 : vector<16x128xf32>
    %13 = arith.mulf %12, %7 : vector<16x128xf32>
    %14 = arith.mulf %6, %13 : vector<16x128xf32>
    %15 = arith.truncf %14 : vector<16x128xf32> to vector<16x128xbf16>
    %c0_6 = arith.constant 0 : index
    %c0_7 = arith.constant 0 : index
    %16 = vector.load %arg5[%c0_6, %c0_7] : memref<128x128xbf16, #tpu.memory_space<vmem>>, vector<128x128xbf16>
    %cst_8 = arith.constant dense<0.000000e+00> : vector<16x128xf32>
    %17 = tpu.matmul %15, %16, %cst_8 {dimension_numbers = #tpu.dot_dimension_numbers<[1], [0], [0], [1], [0, 0, 1, 1], [], []>} : vector<16x128xbf16>, vector<128x128xbf16>, vector<16x128xf32> -> vector<16x128xf32>
    %c0_i32 = arith.constant 0 : i32
    %18 = arith.cmpi eq, %arg1, %c0_i32 : i32
    %19 = arith.extui %18 : i1 to i32
    %c0_i32_9 = arith.constant 0 : i32
    %20 = arith.cmpi ne, %19, %c0_i32_9 : i32
    scf.if %20 {
      %c0_14 = arith.constant 0 : index
      %c0_15 = arith.constant 0 : index
      %27 = vector.load %arg8[%c0_14, %c0_15] : memref<16x128xf32, #tpu.memory_space<vmem>>, vector<16x128xf32>
      tpu.vector_store %arg8[%c0_14, %c0_15], %17 {strides = array<i32>} : memref<16x128xf32, #tpu.memory_space<vmem>>, vector<16x128xf32>,
    } else {
    }
    %c0_i32_10 = arith.constant 0 : i32
    %21 = arith.cmpi sgt, %arg1, %c0_i32_10 : i32
    %22 = arith.extui %21 : i1 to i32
    %c0_i32_11 = arith.constant 0 : i32
    %23 = arith.cmpi ne, %22, %c0_i32_11 : i32
    scf.if %23 {
      %c0_14 = arith.constant 0 : index
      %c0_15 = arith.constant 0 : index
      %27 = vector.load %arg8[%c0_14, %c0_15] : memref<16x128xf32, #tpu.memory_space<vmem>>, vector<16x128xf32>
      %28 = arith.addf %27, %17 : vector<16x128xf32>
      %c0_16 = arith.constant 0 : index
      %c0_17 = arith.constant 0 : index
      %29 = vector.load %arg8[%c0_16, %c0_17] : memref<16x128xf32, #tpu.memory_space<vmem>>, vector<16x128xf32>
      tpu.vector_store %arg8[%c0_16, %c0_17], %28 {strides = array<i32>} : memref<16x128xf32, #tpu.memory_space<vmem>>, vector<16x128xf32>,
    } else {
    }
    %c0_i32_12 = arith.constant 0 : i32
    %24 = arith.cmpi eq, %arg1, %c0_i32_12 : i32
    %25 = arith.extui %24 : i1 to i32
    %c0_i32_13 = arith.constant 0 : i32
    %26 = arith.cmpi ne, %25, %c0_i32_13 : i32
    scf.if %26 {
      %c0_14 = arith.constant 0 : index
      %c0_15 = arith.constant 0 : index
      %27 = vector.load %arg8[%c0_14, %c0_15] : memref<16x128xf32, #tpu.memory_space<vmem>>, vector<16x128xf32>
      %c0_16 = arith.constant 0 : index
      %c0_17 = arith.constant 0 : index
      %28 = vector.load %arg6[%c0_16, %c0_17] : memref<1x128xf32, #tpu.memory_space<vmem>>, vector<1x128xf32>
      %29 = vector.broadcast %28 : vector<1x128xf32> to vector<16x128xf32>
      %30 = arith.addf %27, %29 : vector<16x128xf32>
      %31 = arith.truncf %30 : vector<16x128xf32> to vector<16x128xbf16>
      %c0_18 = arith.constant 0 : index
      %c0_19 = arith.constant 0 : index
      %32 = vector.load %arg7[%c0_18, %c0_19] : memref<16x128xbf16, #tpu.memory_space<vmem>>, vector<16x128xbf16>
      tpu.vector_store %arg7[%c0_18, %c0_19], %31 {strides = array<i32>} : memref<16x128xbf16, #tpu.memory_space<vmem>>, vector<16x128xbf16>,
    } else {
    }
    return
  }
  func.func @transform_0(%arg0: i32, %arg1: i32) -> (i32, i32) {
    %c0_i32 = arith.constant 0 : i32
    %c0_i32_0 = arith.constant 0 : i32
    return %arg0, %c0_i32 : i32, i32
  }
  func.func @transform_1(%arg0: i32, %arg1: i32) -> (i32, i32) {
    %c0_i32 = arith.constant 0 : i32
    %c0_i32_0 = arith.constant 0 : i32
    return %c0_i32, %arg1 : i32, i32
  }
  func.func @transform_2(%arg0: i32, %arg1: i32) -> (i32, i32) {
    %c0_i32 = arith.constant 0 : i32
    %c0_i32_0 = arith.constant 0 : i32
    return %c0_i32, %arg1 : i32, i32
  }
  func.func @transform_3(%arg0: i32, %arg1: i32) -> (i32, i32) {
    %c0_i32 = arith.constant 0 : i32
    %c0_i32_0 = arith.constant 0 : i32
    return %arg1, %c0_i32 : i32, i32
  }
  func.func @transform_4(%arg0: i32, %arg1: i32) -> (i32, i32) {
    %c0_i32 = arith.constant 0 : i32
    %c0_i32_0 = arith.constant 0 : i32
    %c0_i32_1 = arith.constant 0 : i32
    return %c0_i32, %c0_i32_0 : i32, i32
  }
  func.func @transform_5(%arg0: i32, %arg1: i32) -> (i32, i32) {
    %c0_i32 = arith.constant 0 : i32
    %c0_i32_0 = arith.constant 0 : i32
    return %arg0, %c0_i32 : i32, i32
  }
}

</mosaic_0001>

<bundles_post_ra>
// kernel: tpu_custom_call.1
= control target key start
LH: loop header
LB: loop body
LE: loop exit
PB: predicated region body
PF: predicated region fallthrough
CT: control target
= control target key end

     0   :  { %10 = vsyncpa [#allocation4], 0  ;;  %s810_s0 = inlined_call_operand.hbm [shape: bf16[16,128], index: 0, kind: input, shape index: {}]   ;;  %s811_s1 = inlined_call_operand.hbm [shape: bf16[128,256], index: 1, kind: input, shape index: {}]   ;;  %s812_s2 = inlined_call_operand.hbm [shape: f32[1,256], index: 2, kind: input, shape index: {}]   ;;  %s813_s3 = inlined_call_operand.hbm [shape: bf16[128,128], index: 3, kind: input, shape index: {}]   ;;  %s814_s4 = inlined_call_operand.hbm [shape: f32[1,128], index: 4, kind: input, shape index: {}]   ;;  %s815_s5 = inlined_call_operand.hbm [shape: bf16[16,128], index: 5, kind: output, shape index: {}]  }
   0x1   :  { %11 = vsyncpa [#allocation7], 0 }
   0x2   :  { %12 = vsyncpa [#allocation10], 0 }
   0x3   :  { %13 = vsyncpa [#allocation5], 0  ;;  %s686_s18 = smov [#allocation6]   ;;  %s546_s22 = scalar_lea.hbm %s811_s1, 2048 }
   0x4   :  { %s31_s19 = sshll.u32 %s686_s18, 4  ;;  %p547_p0 = scmp.ne.s32.totalorder %s811_s1, %s546_s22  ;;  %s32_s19 = int_to_ptr.vmem [resolvable:$true] %s31_s19 }
   0x5   :  { %p550_p1 = scmp.lt.u32.totalorder %s546_s22, %s811_s1 }
   0x7   :  { %p552_p2 = pnand %p550_p1, %p547_p0 }
   0x9   :  { %555 = shalt.err (!%p552_p2)
}
   0xa   :  { %s556_s27 = scalar_lea.vmem %s32_s19, 2048  ;;  %p561_p4 = scmp.lt.s32.totalorder %s32_s19, %s32_s19 }
   0xb   :  { %p557_p3 = scmp.ne.s32.totalorder %s32_s19, %s556_s27  ;;  %p562_p5 = scmp.lt.s32.totalorder %s556_s27, %s556_s27 }
   0xd   :  { %p563_p6 = por %p562_p5, %p561_p4 }
   0xf   :  { %p564_p7 = pnand %p563_p6, %p557_p3 }
  0x11   :  { %567 = shalt.err (!%p564_p7)
}
  0x12   :  { %s687_s28 = smov 128   ;;  %s688_s29 = smov 8  }
  0x13   :  { %37 = dma.hbm_to_vmem [thread:$0]  %s811_s1, 2048, %s32_s19, [#allocation7], %s687_s28, %s687_s28, %s688_s29  }
  0x14   :  { %s689_s7 = smov [#allocation9]   ;;  %s690_s9 = smov [#allocation3]  }
  0x15   :  { %s53_s8 = sshll.u32 %s689_s7, 4  ;;  %s19_s10 = sshll.u32 %s690_s9, 4  ;;  %s54_s8 = int_to_ptr.vmem [resolvable:$true] %s53_s8  ;;  %s20_s10 = int_to_ptr.vmem [resolvable:$true] %s19_s10 }
  0x16   :  { %s568_s13 = scalar_lea.hbm %s813_s3, 1024 }
  0x17   :  { %p569_p8 = scmp.ne.s32.totalorder %s813_s3, %s568_s13  ;;  %p572_p9 = scmp.lt.u32.totalorder %s568_s13, %s813_s3 }
  0x19   :  { %p574_p10 = pnand %p572_p9, %p569_p8 }
  0x1b   :  { %577 = shalt.err (!%p574_p10)
}
  0x1c   :  { %s578_s1 = scalar_lea.vmem %s54_s8, 1024  ;;  %p583_p12 = scmp.lt.s32.totalorder %s54_s8, %s54_s8 }
  0x1d   :  { %p579_p11 = scmp.ne.s32.totalorder %s54_s8, %s578_s1  ;;  %p584_p13 = scmp.lt.s32.totalorder %s578_s1, %s578_s1 }
  0x1f   :  { %p585_p0 = por %p584_p13, %p583_p12 }
  0x21   :  { %p586_p1 = pnand %p585_p0, %p579_p11 }
  0x23   :  { %589 = shalt.err (!%p586_p1)
}
  0x24   :  { %s691_s18 = smov 64   ;;  %s692_s19 = smov 4  }
  0x25   :  { %59 = dma.hbm_to_vmem [thread:$0]  %s813_s3, 1024, %s54_s8, [#allocation10], %s691_s18, %s691_s18, %s692_s19  }
  0x26   :  { %s590_s24 = scalar_lea.hbm %s810_s0, 128 }
  0x27   :  { %p591_p2 = scmp.ne.s32.totalorder %s810_s0, %s590_s24  ;;  %p594_p3 = scmp.lt.u32.totalorder %s590_s24, %s810_s0 }
  0x29   :  { %p596_p4 = pnand %p594_p3, %p591_p2 }
  0x2b   :  { %599 = shalt.err (!%p596_p4)
}
  0x2c   :  { %s600_s29 = scalar_lea.vmem %s20_s10, 128  ;;  %p605_p6 = scmp.lt.s32.totalorder %s20_s10, %s20_s10 }
  0x2d   :  { %p601_p5 = scmp.ne.s32.totalorder %s20_s10, %s600_s29  ;;  %p606_p7 = scmp.lt.s32.totalorder %s600_s29, %s600_s29 }
  0x2f   :  { %p607_p8 = por %p606_p7, %p605_p6 }
  0x31   :  { %p608_p9 = pnand %p607_p8, %p601_p5 }
  0x33   :  { %611 = shalt.err (!%p608_p9)
}
  0x34   :  { %25 = dma.hbm_to_vmem [thread:$0]  %s810_s0, 128, %s20_s10, [#allocation4], %s691_s18, %s691_s18, %s692_s19  }
  0x35   :  { %s693_s6 = smov [#allocation8]   ;;  %s694_s8 = smov [#allocation11]  }
  0x36   :  { %s44_s7 = sshll.u32 %s693_s6, 4  ;;  %s66_s9 = sshll.u32 %s694_s8, 4  ;;  %s45_s7 = int_to_ptr.vmem [resolvable:$true] %s44_s7  ;;  %s67_s9 = int_to_ptr.vmem [resolvable:$true] %s66_s9 }
  0x37   :  { %s612_s13 = scalar_lea.hbm %s812_s2, 32 }
  0x38   :  { %p613_p10 = scmp.ne.s32.totalorder %s812_s2, %s612_s13  ;;  %p616_p11 = scmp.lt.u32.totalorder %s612_s13, %s812_s2 }
  0x3a   :  { %p618_p12 = pnand %p616_p11, %p613_p10 }
  0x3c   :  { %621 = shalt.err (!%p618_p12)
}
  0x3d   :  { %s622_s0 = scalar_lea.vmem %s45_s7, 32  ;;  %p627_p0 = scmp.lt.s32.totalorder %s45_s7, %s45_s7 }
  0x3e   :  { %p623_p13 = scmp.ne.s32.totalorder %s45_s7, %s622_s0  ;;  %p628_p1 = scmp.lt.s32.totalorder %s622_s0, %s622_s0 }
  0x40   :  { %p629_p2 = por %p628_p1, %p627_p0 }
  0x42   :  { %p630_p3 = pnand %p629_p2, %p623_p13 }
  0x44   :  { %633 = shalt.err (!%p630_p3)
}
  0x45   :  { %47 = dma.hbm_to_vmem [thread:$0]  %s812_s2, 32, %s45_s7, [#allocation7]  }
  0x46   :  { %s634_s22 = scalar_lea.hbm %s814_s4, 16 }
  0x47   :  { %p635_p4 = scmp.ne.s32.totalorder %s814_s4, %s634_s22  ;;  %p638_p5 = scmp.lt.u32.totalorder %s634_s22, %s814_s4 }
  0x49   :  { %p640_p6 = pnand %p638_p5, %p635_p4 }
  0x4b   :  { %643 = shalt.err (!%p640_p6)
}
  0x4c   :  { %s644_s27 = scalar_lea.vmem %s67_s9, 16  ;;  %s648_s28 = scalar_lea.vmem %s67_s9, 32 }
  0x4d   :  { %p645_p7 = scmp.ne.s32.totalorder %s67_s9, %s644_s27  ;;  %p649_p8 = scmp.lt.s32.totalorder %s67_s9, %s67_s9 }
  0x4e   :  { %p650_p9 = scmp.lt.s32.totalorder %s648_s28, %s644_s27 }
  0x50   :  { %p651_p10 = por %p650_p9, %p649_p8 }
  0x52   :  { %p652_p11 = pnand %p651_p10, %p645_p7 }
  0x54   :  { %655 = shalt.err (!%p652_p11)
}
  0x55   :  { %69 = dma.hbm_to_vmem [thread:$0]  %s814_s4, 16, %s67_s9, [#allocation10]  }
  0x56   :  { %678 = dma.done.wait [#allocation4], 128  }
  0x57   :  { %679 = vsyncadd [#allocation4], 4294967168 }
  0x58   :  { %680 = dma.done.wait [#allocation7], 2080  }
  0x59   :  { %681 = vsyncadd [#allocation7], 4294965216 }
  0x5a   :  { %682 = dma.done.wait [#allocation10], 1040  }
  0x5b   :  { %683 = vsyncadd [#allocation10], 4294966256  ;;  %v695_v0 = vmov 0   ;;  %v505_v1 = vld [vmem:[#allocation6 + $0x4] ss:$8 sps:$4 sm:$0xff]   ;;  %v529_v17 = vld [vmem:[#allocation3] sm:$0xff]   ;;  %v106_v27 = vlaneseq }
  0x5c   :  { %234 = vmatprep.mubr.bf16.mxu0 %v695_v0  ;;  %v507_v2 = vld [vmem:[#allocation6] ss:$8 sps:$4 sm:$0xff]   ;;  %202 = vmatprep.subr.bf16.mxu0 %v505_v1  ;;  %v508_v3 = vld [vmem:[#allocation6 + $0x14] ss:$8 sps:$4 sm:$0xff]   ;;  %v510_v4 = vld [vmem:[#allocation6 + $0x10] ss:$8 sps:$4 sm:$0xff]  }
  0x5d   :  { %203 = vmatpush1.bf16.msra.mxu0 %v507_v2  ;;  %v511_v5 = vld [vmem:[#allocation6 + $0x24] ss:$8 sps:$4 sm:$0xff]   ;;  %v513_v6 = vld [vmem:[#allocation6 + $0x20] ss:$8 sps:$4 sm:$0xff]   ;;  %v514_v7 = vld [vmem:[#allocation6 + $0x34] ss:$8 sps:$4 sm:$0xff]  }
  0x5e   :  { %204 = vmatprep.subr.bf16.mxu0 %v508_v3  ;;  %v516_v8 = vld [vmem:[#allocation6 + $0x30] ss:$8 sps:$4 sm:$0xff]   ;;  %v517_v9 = vld [vmem:[#allocation6 + $0x44] ss:$8 sps:$4 sm:$0xff]   ;;  %v519_v10 = vld [vmem:[#allocation6 + $0x40] ss:$8 sps:$4 sm:$0xff]  }
  0x5f   :  { %v520_v11 = vld [vmem:[#allocation6 + $0x54] ss:$8 sps:$4 sm:$0xff]   ;;  %v522_v12 = vld [vmem:[#allocation6 + $0x50] ss:$8 sps:$4 sm:$0xff]   ;;  %v523_v13 = vld [vmem:[#allocation6 + $0x64] ss:$8 sps:$4 sm:$0xff]  }
  0x60   :  { %v525_v14 = vld [vmem:[#allocation6 + $0x60] ss:$8 sps:$4 sm:$0xff]   ;;  %v526_v15 = vld [vmem:[#allocation6 + $0x74] ss:$8 sps:$4 sm:$0xff]   ;;  %v528_v16 = vld [vmem:[#allocation6 + $0x70] ss:$8 sps:$4 sm:$0xff]  }
  0x61   :  { %205 = vmatpush1.bf16.msra.mxu0 %v510_v4  ;;  %v530_v18 = vld [vmem:[#allocation9] sm:$0xff]   ;;  %v696_v19 = vmov 0.0   ;;  %v531_v20 = vld [vmem:[#allocation9 + $0x8] sm:$0xff]   ;;  %v532_v21 = vld [vmem:[#allocation9 + $0x10] sm:$0xff]   ;;  %vm697_vm0 = vmmov 0   ;;  %v107_v28 = vshrl.u32 %v106_v27, 7 }
  0x62   :  { %206 = vmatprep.subr.bf16.mxu0 %v511_v5  ;;  %472 = vmatprep.subr.bf16.mxu1 %v696_v19  ;;  %v533_v22 = vld [vmem:[#allocation9 + $0x18] sm:$0xff]   ;;  %v534_v23 = vld [vmem:[#allocation9 + $0x20] sm:$0xff]   ;;  %v535_v24 = vld [vmem:[#allocation9 + $0x28] sm:$0xff]   ;;  %s698_s4 = smov [#allocation12]  }
  0x63   :  { %473 = vmatpush3.bf16.msra.mxu1 %v530_v18  ;;  %v536_v25 = vld [vmem:[#allocation9 + $0x30] sm:$0xff]   ;;  %v537_v26 = vld [vmem:[#allocation9 + $0x38] sm:$0xff]   ;;  %488 = vmatprep.mubr.msk.bf16.mxu1 %vm697_vm0, %v696_v19  ;;  %v112_v29 = vsub.s32 1, %v107_v28  ;;  %v108_v44 = vsub.s32 0, %v107_v28  ;;  %v453_v56 = vld [vmem:[#allocation11] ss:$0 sm:$0xff] }
  0x64   :  { %474 = vmatprep.subr.bf16.mxu1 %v696_v19  ;;  %v104_v30 = vld [vmem:[#allocation8] sm:$0x3]  ;;  %s412_s3 = sshll.u32 %s698_s4, 4  ;;  %s413_s3 = int_to_ptr.vmem [resolvable:$true] %s412_s3 }
  0x65   :  { %207 = vmatpush1.bf16.msra.mxu0 %v513_v6  ;;  %v113_v31 = vrot.slane %v104_v30, %v112_v29  ;;  %v109_v45 = vrot.slane %v104_v30, %v108_v44  ;;  %s656_s30 = scalar_lea.vmem %s413_s3, 128  ;;  %p661_p13 = scmp.lt.s32.totalorder %s413_s3, %s413_s3 }
  0x66   :  { %208 = vmatprep.subr.bf16.mxu0 %v514_v7  ;;  %p657_p12 = scmp.ne.s32.totalorder %s413_s3, %s656_s30  ;;  %p662_p0 = scmp.lt.s32.totalorder %s656_s30, %s656_s30 }
  0x67   :  { %475 = vmatpush3.bf16.msra.mxu1 %v531_v20 }
  0x68   :  { %476 = vmatprep.subr.bf16.mxu1 %v696_v19  ;;  %p663_p1 = por %p662_p0, %p661_p13 }
  0x69   :  { %209 = vmatpush1.bf16.msra.mxu0 %v516_v8 }
  0x6a   :  { %210 = vmatprep.subr.bf16.mxu0 %v517_v9  ;;  %p664_p2 = pnand %p663_p1, %p657_p12 }
  0x6b   :  { %477 = vmatpush3.bf16.msra.mxu1 %v532_v21 }
  0x6c   :  { %478 = vmatprep.subr.bf16.mxu1 %v696_v19 }
  0x6d   :  { %211 = vmatpush1.bf16.msra.mxu0 %v519_v10 }
  0x6e   :  { %212 = vmatprep.subr.bf16.mxu0 %v520_v11 }
  0x6f   :  { %479 = vmatpush3.bf16.msra.mxu1 %v533_v22 }
  0x70   :  { %480 = vmatprep.subr.bf16.mxu1 %v696_v19 }
  0x71   :  { %213 = vmatpush1.bf16.msra.mxu0 %v522_v12 }
  0x72   :  { %214 = vmatprep.subr.bf16.mxu0 %v523_v13 }
  0x73   :  { %481 = vmatpush3.bf16.msra.mxu1 %v534_v23 }
  0x74   :  { %482 = vmatprep.subr.bf16.mxu1 %v696_v19 }
  0x75   :  { %215 = vmatpush1.bf16.msra.mxu0 %v525_v14 }
  0x76   :  { %216 = vmatprep.subr.bf16.mxu0 %v526_v15 }
  0x77   :  { %483 = vmatpush3.bf16.msra.mxu1 %v535_v24 }
  0x78   :  { %484 = vmatprep.subr.bf16.mxu1 %v696_v19 }
  0x79   :  { %217 = vmatpush1.bf16.msra.mxu0 %v528_v16 }
  0x7b   :  { %485 = vmatpush3.bf16.msra.mxu1 %v536_v25 }
  0x7c   :  { %235 = vmatmul.mubr.bf16.vlgmr.msra.gmra.mrb[0].mxu0 %v529_v17  ;;  %486 = vmatprep.subr.bf16.mxu1 %v696_v19 }
  0x7f   :  { %487 = vmatpush3.bf16.msra.mxu1 %v537_v26 }
 0x14f   :  { %v236_v32 = vpop.f32.mrb[0].mxu0 }
 0x150   :  { %v238_v33 = vpop.f32.mrb[1].mxu0  ;;  %v237_v47 = vadd.f32 %v236_v32, %v109_v45 }
 0x151   :  { %v239_v34 = vadd.f32 %v238_v33, %v113_v31  ;;  %v240_v35 = vpop.f32.mrb[2].mxu0 }
 0x152   :  { %v242_v36 = vpop.f32.mrb[3].mxu0  ;;  %v241_v51 = vadd.f32 %v240_v35, %v109_v45 }
 0x153   :  { %v443_v37 = vmul.f32 -1.442695, %v239_v34  ;;  %v243_v38 = vadd.f32 %v242_v36, %v113_v31 }
 0x155   :  { %538 = vpow2.f32 %v443_v37  ;;  %v444_v39 = vmul.f32 -1.442695, %v243_v38 }
 0x157   :  { %540 = vpow2.f32 %v444_v39 }
 0x15f   :  { %v539_v40 = vpop.eup %538 }
 0x160   :  { %v251_v41 = vadd.f32 1.0, %v539_v40 }
 0x161   :  { %v541_v42 = vpop.eup %540 }
 0x162   :  { %542 = vrcp.f32 %v251_v41  ;;  %v252_v43 = vadd.f32 1.0, %v541_v42 }
 0x164   :  { %544 = vrcp.f32 %v252_v43 }
 0x16c   :  { %v543_v46 = vpop.eup %542 }
 0x16d   :  { %v257_v48 = vmul.f32 %v543_v46, %v239_v34 }
 0x16e   :  { %v545_v49 = vpop.eup %544 }
 0x16f   :  { %v259_v50 = vmul.f32 %v257_v48, %v237_v47  ;;  %v258_v52 = vmul.f32 %v545_v49, %v243_v38 }
 0x171   :  { %v260_v53 = vmul.f32 %v258_v52, %v241_v51 }
 0x173   :  { %v261_v54 = vpack.c.bf16 %v260_v53, %v259_v50 }
 0x175   :  { %489 = vmatmul.mubr.bf16.vlgmr.msra.gmra.mrb[0].mxu1 %v261_v54 }
 0x248   :  { %v360_v55 = vpop.f32.mrb[0].mxu1 }
 0x249   :  { %v490_v57 = vpop.f32.mrb[1].mxu1  ;;  %v395_v59 = vadd.f32 %v453_v56, %v360_v55 }
 0x24a   :  { %v363_v58 = vpop.f32.mrb[2].mxu1 }
 0x24b   :  { %v396_v60 = vadd.f32 %v453_v56, %v363_v58  ;;  %v491_v61 = vpop.f32.mrb[3].mxu1 }
 0x24d   :  { %v461_v62 = vpack.c.bf16 %v396_v60, %v395_v59 }
 0x24f   :  { %462 = vst [vmem:[#allocation12] sm:$0xff] %v461_v62  }
 0x250   :  { %667 = shalt.err (!%p664_p2)
}
 0x251   :  { %s668_s8 = scalar_lea.hbm %s815_s5, 128 }
 0x252   :  { %p669_p3 = scmp.ne.s32.totalorder %s815_s5, %s668_s8  ;;  %p672_p4 = scmp.lt.u32.totalorder %s668_s8, %s815_s5 }
 0x254   :  { %p674_p5 = pnand %p672_p4, %p669_p3 }
 0x256   :  { %677 = shalt.err (!%p674_p5)
}
 0x257   :  { %418 = dma.vmem_to_hbm [thread:$0]  %s413_s3, 128, %s815_s5, [#allocation5], %s691_s18, %s691_s18, %s692_s19  }
 0x258   :  { %684 = dma.done.wait [#allocation5], 128  }
 0x259   :  { %685 = vsyncadd [#allocation5], 4294967168 }
 0x25a   :  { %422 = vsyncpa [#allocation4], 1 }
 0x25b   :  { %423 = vsyncpa [#allocation7], 1 }
 0x25c   :  { %424 = vsyncpa [#allocation10], 1 }
 0x25d   :  { %425 = vsyncpa [#allocation5], 1 }

</bundles_post_ra>
